<compile_context>
chip_gen: v5e
topology: v5e:2x2
jax: 0.10.0
libtpu: 0.0.40
codegen_flags: <defaults>
</compile_context>

<pallas_src>
import functools

import jax
import jax.numpy as jnp
from jax.experimental import pallas as pl
from jax.experimental.pallas import tpu as pltpu

LANE = 128
VMEM_LIMIT = 64 * 1024 * 1024  # <= physical VMEM on v7x(64MiB)/v6e/v5e(128MiB)


def _round_up(x, m):
    return (x + m - 1) // m * m


def _compiler_params(semantics):
    return pltpu.CompilerParams(dimension_semantics=semantics,
                                vmem_limit_bytes=VMEM_LIMIT)


# ----------------------------------------------------------------------------
# Kernel 1: tiled matmul + bias + optional ReLU  (conv1 as 1x1 conv)
#   grid = (M/tm, N/tn, K/tk); f32 accumulator scratch; K last ("arbitrary").
# ----------------------------------------------------------------------------
def _matmul_bias_act_kernel(relu, x_ref, w_ref, b_ref, o_ref, acc_ref):
    @pl.when(pl.program_id(2) == 0)
    def _init():
        acc_ref[...] = jnp.zeros_like(acc_ref)

    acc_ref[...] += jnp.dot(x_ref[...], w_ref[...],
                            preferred_element_type=jnp.float32)

    @pl.when(pl.program_id(2) == pl.num_programs(2) - 1)
    def _finalize():
        out = acc_ref[...] + b_ref[...]
        if relu:
            out = jnp.maximum(out, 0.0)
        o_ref[...] = out.astype(o_ref.dtype)


def matmul_bias_act(x2d, w, bias, relu=True, out_dtype=jnp.bfloat16,
                    tm=512, tn=256, tk=512):
    m, k = x2d.shape
    k2, n = w.shape
    assert k == k2 and k % LANE == 0 and n % LANE == 0
    tm = min(tm, _round_up(m, 8))
    mp = _round_up(m, tm)
    if mp != m:
        x2d = jnp.pad(x2d, ((0, mp - m), (0, 0)))
    tn = tn if n % tn == 0 else LANE
    tk = tk if k % tk == 0 else (256 if k % 256 == 0 else LANE)
    grid = (mp // tm, n // tn, k // tk)
    cost = pl.CostEstimate(
        flops=2 * mp * n * k, transcendentals=0,
        bytes_accessed=2 * (mp * k + k * n) + 4 * n
        + mp * n * jnp.dtype(out_dtype).itemsize)
    out = pl.pallas_call(
        functools.partial(_matmul_bias_act_kernel, relu),
        out_shape=jax.ShapeDtypeStruct((mp, n), out_dtype),
        grid_spec=pltpu.PrefetchScalarGridSpec(
            num_scalar_prefetch=0, grid=grid,
            in_specs=[
                pl.BlockSpec((tm, tk), lambda i, j, l: (i, l)),
                pl.BlockSpec((tk, tn), lambda i, j, l: (l, j)),
                pl.BlockSpec((1, tn), lambda i, j, l: (0, j)),
            ],
            out_specs=pl.BlockSpec((tm, tn), lambda i, j, l: (i, j)),
            scratch_shapes=[pltpu.VMEM((tm, tn), jnp.float32)]),
        compiler_params=_compiler_params(("parallel", "parallel", "arbitrary")),
        cost_estimate=cost,
    )(x2d, w, bias)
    return out[:m] if mp != m else out


# ----------------------------------------------------------------------------
# Kernel 2: 3x3 conv (pad=1, stride 1 or 2) + bias + ReLU, no im2col.
#   grid = (batch, cout_tiles, out_rows). The padded image block is resident
#   in VMEM per batch element; the 9 taps are accumulated as 9 MXU matmuls on
#   shifted row slices. For stride 2 the wrapper passes even/odd column views
#   so all in-kernel slices stay contiguous.
# ----------------------------------------------------------------------------
def _conv3x3_bias_relu_kernel(stride, *refs):
    if stride == 1:
        x_ref, w_ref, b_ref, o_ref = refs
    else:
        xe_ref, xo_ref, w_ref, b_ref, o_ref = refs
    wo = o_ref.shape[2]
    tn = o_ref.shape[3]
    i = pl.program_id(2)                       # output row index
    acc = jnp.zeros((wo, tn), jnp.float32)
    for dh in range(3):                        # taps fully unrolled
        ri = i * stride + dh
        if stride == 1:
            row = x_ref[0, ri]                 # (W+2, Cin)
            patches = (row[0:wo], row[1:wo + 1], row[2:wo + 2])
        else:
            row_e = xe_ref[0, ri]              # even input columns
            row_o = xo_ref[0, ri]              # odd input columns
            patches = (row_e[0:wo], row_o[0:wo], row_e[1:wo + 1])
        for dw in range(3):
            acc += jnp.dot(patches[dw], w_ref[dh, dw],
                           preferred_element_type=jnp.float32)
    out = jnp.maximum(acc + b_ref[...], 0.0)
    o_ref[...] = out[None, None].astype(o_ref.dtype)


def conv3x3_bias_relu(x_nhwc, w, bias, stride, tn=256):
    n, h, wdt, cin = x_nhwc.shape
    _, _, cin2, cout = w.shape
    assert cin == cin2 and cin % LANE == 0 and cout % LANE == 0
    assert stride in (1, 2)
    ho = (h + 2 - 3) // stride + 1
    wo = (wdt + 2 - 3) // stride + 1
    xp = jnp.pad(x_nhwc, ((0, 0), (1, 1), (1, 1), (0, 0)))
    tn = tn if cout % tn == 0 else LANE
    grid = (n, cout // tn, ho)
    if stride == 1:
        acts = [xp]
        act_specs = [pl.BlockSpec((1, h + 2, wdt + 2, cin),
                                  lambda b, j, i: (b, 0, 0, 0))]
    else:
        xe = xp[:, :, 0::2, :]
        xo = xp[:, :, 1::2, :]
        acts = [xe, xo]
        act_specs = [
            pl.BlockSpec((1, h + 2, xe.shape[2], cin),
                         lambda b, j, i: (b, 0, 0, 0)),
            pl.BlockSpec((1, h + 2, xo.shape[2], cin),
                         lambda b, j, i: (b, 0, 0, 0)),
        ]
    cost = pl.CostEstimate(
        flops=2 * n * ho * wo * 9 * cin * cout, transcendentals=0,
        bytes_accessed=2 * (xp.size + w.size + n * ho * wo * cout) + 4 * cout)
    return pl.pallas_call(
        functools.partial(_conv3x3_bias_relu_kernel, stride),
        out_shape=jax.ShapeDtypeStruct((n, ho, wo, cout), jnp.bfloat16),
        grid_spec=pltpu.PrefetchScalarGridSpec(
            num_scalar_prefetch=0, grid=grid,
            in_specs=act_specs + [
                pl.BlockSpec((3, 3, cin, tn), lambda b, j, i: (0, 0, 0, j)),
                pl.BlockSpec((1, tn), lambda b, j, i: (0, j)),
            ],
            out_specs=pl.BlockSpec((1, 1, wo, tn), lambda b, j, i: (b, i, 0, j))),
        compiler_params=_compiler_params(("parallel", "parallel", "arbitrary")),
        cost_estimate=cost,
    )(*acts, w, bias)


# ----------------------------------------------------------------------------
# Kernel 3: conv3 (1x1) + bias + shortcut branch + residual add + ReLU, fused.
#   grid = (M/tm, N/tn); K (planes / in_planes) is loaded in full per tile.
# ----------------------------------------------------------------------------
def _conv3_shortcut_kernel(has_sc_conv, *refs):
    if has_sc_conv:
        a_ref, w3_ref, b3_ref, xs_ref, ws_ref, bs_ref, o_ref = refs
    else:
        a_ref, w3_ref, b3_ref, res_ref, o_ref = refs
    acc = jnp.dot(a_ref[...], w3_ref[...], preferred_element_type=jnp.float32)
    acc = acc + b3_ref[...]
    if has_sc_conv:
        acc = acc + jnp.dot(xs_ref[...], ws_ref[...],
                            preferred_element_type=jnp.float32) + bs_ref[...]
    else:
        acc = acc + res_ref[...].astype(jnp.float32)
    o_ref[...] = jnp.maximum(acc, 0.0).astype(o_ref.dtype)


def conv3_add_shortcut(a2d, w3, b3, shortcut, tm=512, tn=256):
    m, kp = a2d.shape
    _, nfull = w3.shape
    tm = min(tm, _round_up(m, 8))
    mp = _round_up(m, tm)
    tn = tn if nfull % tn == 0 else LANE
    pads = ((0, mp - m), (0, 0))
    a2d_p = jnp.pad(a2d, pads) if mp != m else a2d
    if shortcut[0] == "conv":
        _, xs2d, ws, bs = shortcut
        kc = xs2d.shape[1]
        xs2d_p = jnp.pad(xs2d, pads) if mp != m else xs2d
        args = [a2d_p, w3, b3, xs2d_p, ws, bs]
        in_specs = [
            pl.BlockSpec((tm, kp), lambda i, j: (i, 0)),
            pl.BlockSpec((kp, tn), lambda i, j: (0, j)),
            pl.BlockSpec((1, tn), lambda i, j: (0, j)),
            pl.BlockSpec((tm, kc), lambda i, j: (i, 0)),
            pl.BlockSpec((kc, tn), lambda i, j: (0, j)),
            pl.BlockSpec((1, tn), lambda i, j: (0, j)),
        ]
        flops = 2 * mp * nfull * (kp + kc)
        has_sc_conv = True
    else:
        _, res2d = shortcut
        res2d_p = jnp.pad(res2d, pads) if mp != m else res2d
        args = [a2d_p, w3, b3, res2d_p]
        in_specs = [
            pl.BlockSpec((tm, kp), lambda i, j: (i, 0)),
            pl.BlockSpec((kp, tn), lambda i, j: (0, j)),
            pl.BlockSpec((1, tn), lambda i, j: (0, j)),
            pl.BlockSpec((tm, tn), lambda i, j: (i, j)),
        ]
        flops = 2 * mp * nfull * kp
        has_sc_conv = False
    cost = pl.CostEstimate(
        flops=flops, transcendentals=0,
        bytes_accessed=sum(int(x.size) * x.dtype.itemsize for x in args)
        + 4 * mp * nfull)
    out = pl.pallas_call(
        functools.partial(_conv3_shortcut_kernel, has_sc_conv),
        out_shape=jax.ShapeDtypeStruct((mp, nfull), jnp.float32),
        grid_spec=pltpu.PrefetchScalarGridSpec(
            num_scalar_prefetch=0, grid=(mp // tm, nfull // tn),
            in_specs=in_specs,
            out_specs=pl.BlockSpec((tm, tn), lambda i, j: (i, j))),
        compiler_params=_compiler_params(("parallel", "parallel")),
        cost_estimate=cost,
    )(*args)
    return out[:m] if mp != m else out


# ----------------------------------------------------------------------------
# Parameter prep helpers
# ----------------------------------------------------------------------------
def fold_bn(gamma, beta, running_mean, running_var, eps=1e-5):
    scale = gamma / jnp.sqrt(running_var + eps)
    bias = beta - running_mean * scale
    return scale, bias


# ----------------------------------------------------------------------------
# Bottleneck module
# ----------------------------------------------------------------------------
class BottleneckPallas:
    expansion = 4

    def __init__(self, in_planes, planes, stride=1, key=None):
        if key is None:
            key = jax.random.PRNGKey(0)
        self.in_planes = in_planes
        self.planes = planes
        self.stride = stride
        out_planes = self.expansion * planes
        self.out_planes = out_planes

        ks = jax.random.split(key, 12)

        def wconv(k, shape):  # HWIO
            return (0.1 * jax.random.normal(k, shape)).astype(jnp.float32)

        def bn_params(k1, k2, c):
            gamma = (1.0 + 0.1 * jax.random.normal(k1, (c,))).astype(jnp.float32)
            beta = (0.1 * jax.random.normal(k2, (c,))).astype(jnp.float32)
            return fold_bn(gamma, beta, jnp.zeros((c,), jnp.float32),
                           jnp.ones((c,), jnp.float32))

        self.w1 = wconv(ks[0], (1, 1, in_planes, planes))
        self.s1, self.b1 = bn_params(ks[1], ks[2], planes)
        self.w2 = wconv(ks[3], (3, 3, planes, planes))
        self.s2, self.b2 = bn_params(ks[4], ks[5], planes)
        self.w3 = wconv(ks[6], (1, 1, planes, out_planes))
        self.s3, self.b3 = bn_params(ks[7], ks[8], out_planes)
        self.has_shortcut = (stride != 1) or (in_planes != out_planes)
        if self.has_shortcut:
            self.ws = wconv(ks[9], (1, 1, in_planes, out_planes))
            self.ss, self.bs = bn_params(ks[10], ks[11], out_planes)

        # Pallas-side params: BN scale folded into weights, channels padded to
        # multiples of 128 (lane-dense stores / full MXU columns), bf16.
        self.cin_p = _round_up(in_planes, LANE)
        self.p_p = _round_up(planes, LANE)
        self.op_p = _round_up(out_planes, LANE)

        def prep_w_1x1(w, scale, cin, cout, cin_p, cout_p):
            w2d = w.reshape(cin, cout) * scale[None, :]
            w2d = jnp.pad(w2d, ((0, cin_p - cin), (0, cout_p - cout)))
            return w2d.astype(jnp.bfloat16)

        def prep_b(b, cout, cout_p):
            return jnp.pad(b, (0, cout_p - cout)).reshape(1, cout_p).astype(jnp.float32)

        self.w1_k = prep_w_1x1(self.w1, self.s1, in_planes, planes,
                               self.cin_p, self.p_p)
        self.b1_k = prep_b(self.b1, planes, self.p_p)

        w2s = self.w2 * self.s2[None, None, None, :]
        w2s = jnp.pad(w2s, ((0, 0), (0, 0),
                            (0, self.p_p - planes), (0, self.p_p - planes)))
        self.w2_k = w2s.astype(jnp.bfloat16)
        self.b2_k = prep_b(self.b2, planes, self.p_p)

        self.w3_k = prep_w_1x1(self.w3, self.s3, planes, out_planes,
                               self.p_p, self.op_p)
        self.b3_k = prep_b(self.b3, out_planes, self.op_p)

        if self.has_shortcut:
            self.ws_k = prep_w_1x1(self.ws, self.ss, in_planes, out_planes,
                                   self.cin_p, self.op_p)
            self.bs_k = prep_b(self.bs, out_planes, self.op_p)

    def __call__(self, x_nchw):
        # TODO(synk): when stacking blocks, keep NHWC between blocks and hoist
        # this transpose (pure layout plumbing) to the network boundary.
        x = jnp.transpose(x_nchw, (0, 2, 3, 1))   # NCHW -> NHWC
        n, h, w, c = x.shape
        assert c == self.in_planes
        s = self.stride
        xp = jnp.pad(x, ((0, 0), (0, 0), (0, 0),
                         (0, self.cin_p - c))).astype(jnp.bfloat16)

        # conv1 (1x1) + BN1 + ReLU -- tiled matmul kernel
        out1 = matmul_bias_act(xp.reshape(-1, self.cin_p), self.w1_k, self.b1_k,
                               relu=True).reshape(n, h, w, self.p_p)

        # conv2 (3x3, stride, pad=1) + BN2 + ReLU -- tap-fused kernel, no im2col
        out2 = conv3x3_bias_relu(out1, self.w2_k, self.b2_k, s)
        ho, wo = out2.shape[1], out2.shape[2]
        out2_2d = out2.reshape(-1, self.p_p)

        # conv3 (1x1) + BN3 + shortcut + residual add + ReLU -- single kernel
        if self.has_shortcut:
            xs = xp[:, ::s, ::s, :][:, :ho, :wo, :].reshape(-1, self.cin_p)
            shortcut = ("conv", xs, self.ws_k, self.bs_k)
        else:
            shortcut = ("identity", xp.reshape(-1, self.op_p))
        out3 = conv3_add_shortcut(out2_2d, self.w3_k, self.b3_k, shortcut)
        out3 = out3.reshape(n, ho, wo, self.op_p)[..., :self.out_planes]
        return jnp.transpose(out3, (0, 3, 1, 2))  # -> NCHW


# ----------------------------------------------------------------------------
# Reference (lax.conv), mirroring the bf16 activation/weight precision
# ----------------------------------------------------------------------------
def reference_forward(block, x_nchw):
    x = jnp.transpose(x_nchw, (0, 2, 3, 1)).astype(jnp.bfloat16)
    dn = ("NHWC", "HWIO", "NHWC")

    def conv(a, w, stride, pad):
        return jax.lax.conv_general_dilated(
            a, w.astype(jnp.bfloat16), window_strides=(stride, stride),
            padding=[(pad, pad), (pad, pad)], dimension_numbers=dn,
            preferred_element_type=jnp.float32)

    def bn(y, scale, bias):
        return y * scale + bias

    out = jax.nn.relu(bn(conv(x, block.w1, 1, 0),
                         block.s1, block.b1)).astype(jnp.bfloat16)
    out = jax.nn.relu(bn(conv(out, block.w2, block.stride, 1),
                         block.s2, block.b2)).astype(jnp.bfloat16)
    out = bn(conv(out, block.w3, 1, 0), block.s3, block.b3)
    if block.has_shortcut:
        sc = bn(conv(x, block.ws, block.stride, 0), block.ss, block.bs)
    else:
        sc = x.astype(jnp.float32)
    out = jax.nn.relu(out + sc)
    return jnp.transpose(out, (0, 3, 1, 2))


if __name__ == "__main__":
    key = jax.random.PRNGKey(0)
    kx1, kx2, kp1, kp2, kp3 = jax.random.split(key, 5)

    # Covers: conv-shortcut stride 1, conv-shortcut stride 2, identity shortcut.
    configs = [(4, 4, 1, kp1), (4, 4, 2, kp2), (16, 4, 1, kp3)]
    x_by_cin = {
        4: jax.random.normal(kx1, (2, 4, 16, 16), dtype=jnp.float32),
        16: jax.random.normal(kx2, (2, 16, 16, 16), dtype=jnp.float32),
    }

    ok = True
    for in_planes, planes, stride, kp in configs:
        x = x_by_cin[in_planes]
        block = BottleneckPallas(in_planes, planes, stride=stride, key=kp)
        out = jax.block_until_ready(block(x))
        ref = jax.block_until_ready(reference_forward(block, x))
        assert out.shape == ref.shape
        if not jnp.allclose(out, ref, rtol=2e-2, atol=2e-2):
            ok = False

    if ok:
        print("KERNEL_OK")
</pallas_src>

<mosaic_0001>
module attributes {stable_mosaic.version = 11 : i64} {
  func.func @_matmul_bias_act_kernel(%arg0: i32, %arg1: i32, %arg2: i32, %arg3: memref<512x128xbf16, #tpu.memory_space<vmem>>, %arg4: memref<128x128xbf16, #tpu.memory_space<vmem>>, %arg5: memref<1x128xf32, #tpu.memory_space<vmem>>, %arg6: memref<512x128xbf16, #tpu.memory_space<vmem>>, %arg7: memref<512x128xf32, #tpu.memory_space<vmem>>) attributes {dimension_semantics = [#tpu.dimension_semantics<parallel>, #tpu.dimension_semantics<parallel>, #tpu.dimension_semantics<arbitrary>], iteration_bounds = array<i64: 1, 1, 1>, scalar_prefetch = 0 : i64, scratch_operands = 1 : i64, tpu.core_type = #tpu.core_type<tc>, window_params = [{transform_indices = @transform_0, window_bounds = array<i64: 512, 128>}, {transform_indices = @transform_1, window_bounds = array<i64: 128, 128>}, {transform_indices = @transform_2, window_bounds = array<i64: 1, 128>}, {transform_indices = @transform_3, window_bounds = array<i64: 512, 128>}]} {
    %c0_i32 = arith.constant 0 : i32
    %0 = arith.cmpi eq, %arg2, %c0_i32 : i32
    %1 = arith.extui %0 : i1 to i32
    %c0_i32_0 = arith.constant 0 : i32
    %2 = arith.cmpi ne, %1, %c0_i32_0 : i32
    scf.if %2 {
      %cst_10 = arith.constant 0.000000e+00 : f32
      %12 = vector.broadcast %cst_10 : f32 to vector<512x128xf32>
      %c0_11 = arith.constant 0 : index
      %c0_12 = arith.constant 0 : index
      %13 = vector.load %arg7[%c0_11, %c0_12] : memref<512x128xf32, #tpu.memory_space<vmem>>, vector<512x128xf32>
      tpu.vector_store %arg7[%c0_11, %c0_12], %12 {strides = array<i32>} : memref<512x128xf32, #tpu.memory_space<vmem>>, vector<512x128xf32>,
    } else {
    }
    %c0 = arith.constant 0 : index
    %c0_1 = arith.constant 0 : index
    %3 = vector.load %arg7[%c0, %c0_1] : memref<512x128xf32, #tpu.memory_space<vmem>>, vector<512x128xf32>
    %c0_2 = arith.constant 0 : index
    %c0_3 = arith.constant 0 : index
    %4 = vector.load %arg3[%c0_2, %c0_3] : memref<512x128xbf16, #tpu.memory_space<vmem>>, vector<512x128xbf16>
    %c0_4 = arith.constant 0 : index
    %c0_5 = arith.constant 0 : index
    %5 = vector.load %arg4[%c0_4, %c0_5] : memref<128x128xbf16, #tpu.memory_space<vmem>>, vector<128x128xbf16>
    %cst = arith.constant dense<0.000000e+00> : vector<512x128xf32>
    %6 = tpu.matmul %4, %5, %cst {dimension_numbers = #tpu.dot_dimension_numbers<[1], [0], [0], [1], [0, 0, 1, 1], [], []>} : vector<512x128xbf16>, vector<128x128xbf16>, vector<512x128xf32> -> vector<512x128xf32>
    %7 = arith.addf %3, %6 : vector<512x128xf32>
    %c0_6 = arith.constant 0 : index
    %c0_7 = arith.constant 0 : index
    %8 = vector.load %arg7[%c0_6, %c0_7] : memref<512x128xf32, #tpu.memory_space<vmem>>, vector<512x128xf32>
    tpu.vector_store %arg7[%c0_6, %c0_7], %7 {strides = array<i32>} : memref<512x128xf32, #tpu.memory_space<vmem>>, vector<512x128xf32>,
    %c0_i32_8 = arith.constant 0 : i32
    %9 = arith.cmpi eq, %arg2, %c0_i32_8 : i32
    %10 = arith.extui %9 : i1 to i32
    %c0_i32_9 = arith.constant 0 : i32
    %11 = arith.cmpi ne, %10, %c0_i32_9 : i32
    scf.if %11 {
      %c0_10 = arith.constant 0 : index
      %c0_11 = arith.constant 0 : index
      %12 = vector.load %arg7[%c0_10, %c0_11] : memref<512x128xf32, #tpu.memory_space<vmem>>, vector<512x128xf32>
      %c0_12 = arith.constant 0 : index
      %c0_13 = arith.constant 0 : index
      %13 = vector.load %arg5[%c0_12, %c0_13] : memref<1x128xf32, #tpu.memory_space<vmem>>, vector<1x128xf32>
      %14 = vector.broadcast %13 : vector<1x128xf32> to vector<512x128xf32>
      %15 = arith.addf %12, %14 : vector<512x128xf32>
      %cst_14 = arith.constant 0.000000e+00 : f32
      %16 = vector.broadcast %cst_14 : f32 to vector<512x128xf32>
      %17 = arith.maximumf %15, %16 : vector<512x128xf32>
      %18 = arith.truncf %17 : vector<512x128xf32> to vector<512x128xbf16>
      %c0_15 = arith.constant 0 : index
      %c0_16 = arith.constant 0 : index
      %19 = vector.load %arg6[%c0_15, %c0_16] : memref<512x128xbf16, #tpu.memory_space<vmem>>, vector<512x128xbf16>
      tpu.vector_store %arg6[%c0_15, %c0_16], %18 {strides = array<i32>} : memref<512x128xbf16, #tpu.memory_space<vmem>>, vector<512x128xbf16>,
    } else {
    }
    return
  }
  func.func @transform_0(%arg0: i32, %arg1: i32, %arg2: i32) -> (i32, i32) {
    %c0_i32 = arith.constant 0 : i32
    return %arg0, %arg2 : i32, i32
  }
  func.func @transform_1(%arg0: i32, %arg1: i32, %arg2: i32) -> (i32, i32) {
    %c0_i32 = arith.constant 0 : i32
    return %arg2, %arg1 : i32, i32
  }
  func.func @transform_2(%arg0: i32, %arg1: i32, %arg2: i32) -> (i32, i32) {
    %c0_i32 = arith.constant 0 : i32
    %c0_i32_0 = arith.constant 0 : i32
    return %c0_i32, %arg1 : i32, i32
  }
  func.func @transform_3(%arg0: i32, %arg1: i32, %arg2: i32) -> (i32, i32) {
    %c0_i32 = arith.constant 0 : i32
    return %arg0, %arg1 : i32, i32
  }
}

</mosaic_0001>

<bundles_post_ra>
// kernel: tpu_custom_call.1
= control target key start
LH: loop header
LB: loop body
LE: loop exit
PB: predicated region body
PF: predicated region fallthrough
CT: control target
= control target key end

     0   :  { %8 = vsyncpa [#allocation4], 0  ;;  %s1754_s0 = inlined_call_operand.hbm [shape: bf16[512,128], index: 0, kind: input, shape index: {}]   ;;  %s1755_s1 = inlined_call_operand.hbm [shape: bf16[128,128], index: 1, kind: input, shape index: {}]   ;;  %s1756_s2 = inlined_call_operand.vmem [shape: f32[1,128], index: 2, kind: input, shape index: {}]   ;;  %s1757_s3 = inlined_call_operand.hbm [shape: bf16[512,128], index: 3, kind: output, shape index: {}]  }
   0x1   :  { %9 = vsyncpa [#allocation7], 0 }
   0x2   :  { %10 = vsyncpa [#allocation5], 0  ;;  %s15_s14 = sshll.u32 %s1754_s0, 4  ;;  %s1642_s15 = smov [#allocation3]   ;;  %s16_s14 = int_to_ptr.hbm [resolvable:$true] %s15_s14 }
   0x3   :  { %s17_s16 = sshll.u32 %s1642_s15, 4  ;;  %s28_s19 = sshll.u32 %s1755_s1, 4  ;;  %s18_s16 = int_to_ptr.vmem [resolvable:$true] %s17_s16  ;;  %s29_s19 = int_to_ptr.hbm [resolvable:$true] %s28_s19 }
   0x4   :  { %s1643_s20 = smov 64   ;;  %s1644_s21 = smov 4  }
   0x5   :  { %23 = dma.hbm_to_vmem [thread:$0]  %s16_s14, 4096, %s18_s16, [#allocation4], %s1643_s20, %s1643_s20, %s1644_s21  }
   0x6   :  { %s1645_s22 = smov [#allocation6]  }
   0x7   :  { %s30_s23 = sshll.u32 %s1645_s22, 4  ;;  %s31_s23 = int_to_ptr.vmem [resolvable:$true] %s30_s23 }
   0x8   :  { %36 = dma.hbm_to_vmem [thread:$0]  %s29_s19, 1024, %s31_s23, [#allocation7], %s1643_s20, %s1643_s20, %s1644_s21  }
   0x9   :  { %1636 = dma.done.wait [#allocation4], 4096  }
   0xa   :  { %1637 = vsyncadd [#allocation4], 4294963200 }
   0xb   :  { %1638 = dma.done.wait [#allocation7], 1024  }
   0xc   :  { %1639 = vsyncadd [#allocation7], 4294966272  ;;  %v1342_v0 = vld [vmem:[#allocation6 + $0x38] sm:$0xff]  ;;  %v1341_v1 = vld [vmem:[#allocation6 + $0x30] sm:$0xff]  ;;  %s1129_s27 = sshll.u32 %s1757_s3, 4  ;;  %s1130_s27 = int_to_ptr.hbm [resolvable:$true] %s1129_s27 }
   0xd   :  { %499 = vmatpush.bf16.msra.mxu0 %v1342_v0  ;;  %1534 = vmatpush.bf16.msra.mxu1 %v1342_v0  ;;  %v1340_v2 = vld [vmem:[#allocation6 + $0x28] sm:$0xff]  ;;  %v1339_v3 = vld [vmem:[#allocation6 + $0x20] sm:$0xff]  ;;  %v1338_v4 = vld [vmem:[#allocation6 + $0x18] sm:$0xff] }
   0xe   :  { %1535 = vmatpush.bf16.msra.mxu2 %v1342_v0  ;;  %1536 = vmatpush.bf16.msra.mxu3 %v1342_v0  ;;  %v1337_v5 = vld [vmem:[#allocation6 + $0x10] sm:$0xff]  ;;  %v1336_v6 = vld [vmem:[#allocation6 + $0x8] sm:$0xff]  ;;  %v1335_v7 = vld [vmem:[#allocation6] sm:$0xff] }
   0xf   :  { %v1303_v8 = vld [vmem:[#allocation3] sm:$0xff]  ;;  %v1304_v12 = vld [vmem:[#allocation3 + $0x8] sm:$0xff]  ;;  %v1305_v16 = vld [vmem:[#allocation3 + $0x10] sm:$0xff] }
  0x10   :  { %v1311_v9 = vld [vmem:[#allocation3 + $0x40] sm:$0xff]  ;;  %v1312_v13 = vld [vmem:[#allocation3 + $0x48] sm:$0xff]  ;;  %v1313_v17 = vld [vmem:[#allocation3 + $0x50] sm:$0xff] }
  0x11   :  { %500 = vmatpush.bf16.msra.mxu0 %v1341_v1  ;;  %1537 = vmatpush.bf16.msra.mxu1 %v1341_v1  ;;  %v1319_v10 = vld [vmem:[#allocation3 + $0x80] sm:$0xff]  ;;  %v1320_v14 = vld [vmem:[#allocation3 + $0x88] sm:$0xff]  ;;  %v1321_v18 = vld [vmem:[#allocation3 + $0x90] sm:$0xff] }
  0x12   :  { %1538 = vmatpush.bf16.msra.mxu2 %v1341_v1  ;;  %1539 = vmatpush.bf16.msra.mxu3 %v1341_v1  ;;  %v1327_v11 = vld [vmem:[#allocation3 + $0xc0] sm:$0xff]  ;;  %v1328_v15 = vld [vmem:[#allocation3 + $0xc8] sm:$0xff]  ;;  %v1329_v19 = vld [vmem:[#allocation3 + $0xd0] sm:$0xff] }
  0x13   :  { %v1306_v20 = vld [vmem:[#allocation3 + $0x18] sm:$0xff]  ;;  %v1307_v24 = vld [vmem:[#allocation3 + $0x20] sm:$0xff]  ;;  %v1308_v28 = vld [vmem:[#allocation3 + $0x28] sm:$0xff] }
  0x14   :  { %v1314_v21 = vld [vmem:[#allocation3 + $0x58] sm:$0xff]  ;;  %v1315_v25 = vld [vmem:[#allocation3 + $0x60] sm:$0xff]  ;;  %v1316_v29 = vld [vmem:[#allocation3 + $0x68] sm:$0xff] }
  0x15   :  { %501 = vmatpush.bf16.msra.mxu0 %v1340_v2  ;;  %1540 = vmatpush.bf16.msra.mxu1 %v1340_v2  ;;  %v1322_v22 = vld [vmem:[#allocation3 + $0x98] sm:$0xff]  ;;  %v1323_v26 = vld [vmem:[#allocation3 + $0xa0] sm:$0xff]  ;;  %v1324_v30 = vld [vmem:[#allocation3 + $0xa8] sm:$0xff] }
  0x16   :  { %1541 = vmatpush.bf16.msra.mxu2 %v1340_v2  ;;  %1542 = vmatpush.bf16.msra.mxu3 %v1340_v2  ;;  %v1330_v23 = vld [vmem:[#allocation3 + $0xd8] sm:$0xff]  ;;  %v1331_v27 = vld [vmem:[#allocation3 + $0xe0] sm:$0xff]  ;;  %v1332_v31 = vld [vmem:[#allocation3 + $0xe8] sm:$0xff] }
  0x17   :  { %v1309_v32 = vld [vmem:[#allocation3 + $0x30] sm:$0xff]  ;;  %v1310_v36 = vld [vmem:[#allocation3 + $0x38] sm:$0xff]  ;;  %v1682_v42 = vld [vmem:[%s1756_s2] ss:$0 sm:$0xff]  ;;  %s1646_s2 = smov [#allocation8]  }
  0x18   :  { %v1317_v33 = vld [vmem:[#allocation3 + $0x70] sm:$0xff]  ;;  %v1318_v37 = vld [vmem:[#allocation3 + $0x78] sm:$0xff]  ;;  %s1127_s24 = sshll.u32 %s1646_s2, 4  ;;  %s1128_s24 = int_to_ptr.vmem [resolvable:$true] %s1127_s24 }
  0x19   :  { %502 = vmatpush.bf16.msra.mxu0 %v1339_v3  ;;  %1543 = vmatpush.bf16.msra.mxu1 %v1339_v3  ;;  %v1325_v34 = vld [vmem:[#allocation3 + $0xb0] sm:$0xff]  ;;  %v1326_v38 = vld [vmem:[#allocation3 + $0xb8] sm:$0xff] }
  0x1a   :  { %1544 = vmatpush.bf16.msra.mxu2 %v1339_v3  ;;  %1545 = vmatpush.bf16.msra.mxu3 %v1339_v3  ;;  %v1333_v35 = vld [vmem:[#allocation3 + $0xf0] sm:$0xff]  ;;  %v1334_v39 = vld [vmem:[#allocation3 + $0xf8] sm:$0xff] }
  0x1d   :  { %503 = vmatpush.bf16.msra.mxu0 %v1338_v4  ;;  %1546 = vmatpush.bf16.msra.mxu1 %v1338_v4 }
  0x1e   :  { %1547 = vmatpush.bf16.msra.mxu2 %v1338_v4  ;;  %1548 = vmatpush.bf16.msra.mxu3 %v1338_v4 }
  0x21   :  { %504 = vmatpush.bf16.msra.mxu0 %v1337_v5  ;;  %1549 = vmatpush.bf16.msra.mxu1 %v1337_v5 }
  0x22   :  { %1550 = vmatpush.bf16.msra.mxu2 %v1337_v5  ;;  %1551 = vmatpush.bf16.msra.mxu3 %v1337_v5 }
  0x25   :  { %505 = vmatpush.bf16.msra.mxu0 %v1336_v6  ;;  %1552 = vmatpush.bf16.msra.mxu1 %v1336_v6 }
  0x26   :  { %1553 = vmatpush.bf16.msra.mxu2 %v1336_v6  ;;  %1554 = vmatpush.bf16.msra.mxu3 %v1336_v6 }
  0x29   :  { %506 = vmatpush.bf16.msra.mxu0 %v1335_v7  ;;  %1555 = vmatpush.bf16.msra.mxu1 %v1335_v7 }
  0x2a   :  { %1556 = vmatpush.bf16.msra.mxu2 %v1335_v7  ;;  %1557 = vmatpush.bf16.msra.mxu3 %v1335_v7 }
  0x2c   :  { %507 = vmatmul.bf16.vlgmr.msra.gmra.mxu0 %v1303_v8  ;;  %547 = vmatmul.bf16.vlgmr.msra.gmra.mxu1 %v1311_v9 }
  0x2d   :  { %587 = vmatmul.bf16.vlgmr.msra.gmra.mxu2 %v1319_v10  ;;  %627 = vmatmul.bf16.vlgmr.msra.gmra.mxu3 %v1327_v11 }
  0x3c   :  { %512 = vmatmul.bf16.gmra.mxu0 %v1304_v12  ;;  %552 = vmatmul.bf16.gmra.mxu1 %v1312_v13 }
  0x3d   :  { %592 = vmatmul.bf16.gmra.mxu2 %v1320_v14  ;;  %632 = vmatmul.bf16.gmra.mxu3 %v1328_v15 }
  0x4c   :  { %517 = vmatmul.bf16.gmra.mxu0 %v1305_v16  ;;  %557 = vmatmul.bf16.gmra.mxu1 %v1313_v17 }
  0x4d   :  { %597 = vmatmul.bf16.gmra.mxu2 %v1321_v18  ;;  %637 = vmatmul.bf16.gmra.mxu3 %v1329_v19 }
  0x5c   :  { %522 = vmatmul.bf16.gmra.mxu0 %v1306_v20  ;;  %562 = vmatmul.bf16.gmra.mxu1 %v1314_v21 }
  0x5d   :  { %602 = vmatmul.bf16.gmra.mxu2 %v1322_v22  ;;  %642 = vmatmul.bf16.gmra.mxu3 %v1330_v23 }
  0x6c   :  { %527 = vmatmul.bf16.gmra.mxu0 %v1307_v24  ;;  %567 = vmatmul.bf16.gmra.mxu1 %v1315_v25 }
  0x6d   :  { %607 = vmatmul.bf16.gmra.mxu2 %v1323_v26  ;;  %647 = vmatmul.bf16.gmra.mxu3 %v1331_v27 }
  0x7c   :  { %532 = vmatmul.bf16.gmra.mxu0 %v1308_v28  ;;  %572 = vmatmul.bf16.gmra.mxu1 %v1316_v29 }
  0x7d   :  { %612 = vmatmul.bf16.gmra.mxu2 %v1324_v30  ;;  %652 = vmatmul.bf16.gmra.mxu3 %v1332_v31 }
  0x8c   :  { %537 = vmatmul.bf16.gmra.mxu0 %v1309_v32  ;;  %577 = vmatmul.bf16.gmra.mxu1 %v1317_v33 }
  0x8d   :  { %617 = vmatmul.bf16.gmra.mxu2 %v1325_v34  ;;  %657 = vmatmul.bf16.gmra.mxu3 %v1333_v35 }
  0x9c   :  { %542 = vmatmul.bf16.gmra.mxu0 %v1310_v36  ;;  %582 = vmatmul.bf16.gmra.mxu1 %v1318_v37 }
  0x9d   :  { %622 = vmatmul.bf16.gmra.mxu2 %v1326_v38  ;;  %662 = vmatmul.bf16.gmra.mxu3 %v1334_v39 }
  0xa9   :  { %v508_v40 = vpop.f32.mrf.mxu0  ;;  %v548_v41 = vpop.f32.mrf.mxu1 }
  0xaa   :  { %v867_v43 = vadd.f32 %v1682_v42, %v508_v40  ;;  %v883_v44 = vadd.f32 %v1682_v42, %v548_v41 }
  0xac   :  { %v931_v51 = vmax.f32 %v867_v43, 0.0  ;;  %v947_v52 = vmax.f32 %v883_v44, 0.0 }
  0xb0   :  { %v588_v45 = vpop.f32.mrf.mxu2  ;;  %v628_v46 = vpop.f32.mrf.mxu3 }
  0xb1   :  { %v510_v47 = vpop.f32.mrf.mxu0  ;;  %v550_v48 = vpop.f32.mrf.mxu1  ;;  %v899_v57 = vadd.f32 %v1682_v42, %v588_v45  ;;  %v915_v58 = vadd.f32 %v1682_v42, %v628_v46 }
  0xb2   :  { %v868_v49 = vadd.f32 %v1682_v42, %v510_v47  ;;  %v884_v50 = vadd.f32 %v1682_v42, %v550_v48 }
  0xb3   :  { %v963_v1 = vmax.f32 %v899_v57, 0.0  ;;  %v979_v2 = vmax.f32 %v915_v58, 0.0 }
  0xb4   :  { %v932_v53 = vmax.f32 %v868_v49, 0.0  ;;  %v948_v54 = vmax.f32 %v884_v50, 0.0 }
  0xb6   :  { %v1346_v55 = vpack.c.bf16 %v932_v53, %v931_v51  ;;  %v1386_v56 = vpack.c.bf16 %v948_v54, %v947_v52 }
  0xb8   :  { %1347 = vst [vmem:[#allocation8] sm:$0xff] %v1346_v55   ;;  %v590_v59 = vpop.f32.mrf.mxu2  ;;  %v630_v60 = vpop.f32.mrf.mxu3 }
  0xb9   :  { %1510 = vst [vmem:[#allocation8 + $0x40] sm:$0xff] %v1386_v56   ;;  %v900_v61 = vadd.f32 %v1682_v42, %v590_v59  ;;  %v916_v62 = vadd.f32 %v1682_v42, %v630_v60  ;;  %v513_v63 = vpop.f32.mrf.mxu0  ;;  %v553_v0 = vpop.f32.mrf.mxu1 }
  0xba   :  { %v869_v7 = vadd.f32 %v1682_v42, %v513_v63  ;;  %v885_v8 = vadd.f32 %v1682_v42, %v553_v0 }
  0xbb   :  { %v964_v3 = vmax.f32 %v900_v61, 0.0  ;;  %v980_v4 = vmax.f32 %v916_v62, 0.0 }
  0xbc   :  { %v933_v15 = vmax.f32 %v869_v7, 0.0  ;;  %v949_v16 = vmax.f32 %v885_v8, 0.0 }
  0xbd   :  { %v1426_v5 = vpack.c.bf16 %v964_v3, %v963_v1  ;;  %v1466_v6 = vpack.c.bf16 %v980_v4, %v979_v2 }
  0xbf   :  { %1518 = vst [vmem:[#allocation8 + $0x80] sm:$0xff] %v1426_v5  }
  0xc0   :  { %1526 = vst [vmem:[#allocation8 + $0xc0] sm:$0xff] %v1466_v6   ;;  %v593_v9 = vpop.f32.mrf.mxu2  ;;  %v633_v10 = vpop.f32.mrf.mxu3 }
  0xc1   :  { %v515_v11 = vpop.f32.mrf.mxu0  ;;  %v555_v12 = vpop.f32.mrf.mxu1  ;;  %v901_v21 = vadd.f32 %v1682_v42, %v593_v9  ;;  %v917_v22 = vadd.f32 %v1682_v42, %v633_v10 }
  0xc2   :  { %v870_v13 = vadd.f32 %v1682_v42, %v515_v11  ;;  %v886_v14 = vadd.f32 %v1682_v42, %v555_v12 }
  0xc3   :  { %v965_v29 = vmax.f32 %v901_v21, 0.0  ;;  %v981_v30 = vmax.f32 %v917_v22, 0.0 }
  0xc4   :  { %v934_v17 = vmax.f32 %v870_v13, 0.0  ;;  %v950_v18 = vmax.f32 %v886_v14, 0.0 }
  0xc6   :  { %v1351_v19 = vpack.c.bf16 %v934_v17, %v933_v15  ;;  %v1391_v20 = vpack.c.bf16 %v950_v18, %v949_v16 }
  0xc8   :  { %1503 = vst [vmem:[#allocation8 + $0x8] sm:$0xff] %v1351_v19   ;;  %v595_v23 = vpop.f32.mrf.mxu2  ;;  %v635_v24 = vpop.f32.mrf.mxu3 }
  0xc9   :  { %1511 = vst [vmem:[#allocation8 + $0x48] sm:$0xff] %v1391_v20   ;;  %v902_v25 = vadd.f32 %v1682_v42, %v595_v23  ;;  %v918_v26 = vadd.f32 %v1682_v42, %v635_v24  ;;  %v518_v27 = vpop.f32.mrf.mxu0  ;;  %v558_v28 = vpop.f32.mrf.mxu1 }
  0xca   :  { %v871_v35 = vadd.f32 %v1682_v42, %v518_v27  ;;  %v887_v36 = vadd.f32 %v1682_v42, %v558_v28 }
  0xcb   :  { %v966_v31 = vmax.f32 %v902_v25, 0.0  ;;  %v982_v32 = vmax.f32 %v918_v26, 0.0 }
  0xcc   :  { %v935_v44 = vmax.f32 %v871_v35, 0.0  ;;  %v951_v45 = vmax.f32 %v887_v36, 0.0 }
  0xcd   :  { %v1431_v33 = vpack.c.bf16 %v966_v31, %v965_v29  ;;  %v1471_v34 = vpack.c.bf16 %v982_v32, %v981_v30 }
  0xcf   :  { %1519 = vst [vmem:[#allocation8 + $0x88] sm:$0xff] %v1431_v33  }
  0xd0   :  { %1527 = vst [vmem:[#allocation8 + $0xc8] sm:$0xff] %v1471_v34   ;;  %v598_v37 = vpop.f32.mrf.mxu2  ;;  %v638_v38 = vpop.f32.mrf.mxu3 }
  0xd1   :  { %v520_v39 = vpop.f32.mrf.mxu0  ;;  %v560_v40 = vpop.f32.mrf.mxu1  ;;  %v903_v50 = vadd.f32 %v1682_v42, %v598_v37  ;;  %v919_v51 = vadd.f32 %v1682_v42, %v638_v38 }
  0xd2   :  { %v872_v41 = vadd.f32 %v1682_v42, %v520_v39  ;;  %v888_v43 = vadd.f32 %v1682_v42, %v560_v40 }
  0xd3   :  { %v967_v58 = vmax.f32 %v903_v50, 0.0  ;;  %v983_v59 = vmax.f32 %v919_v51, 0.0 }
  0xd4   :  { %v936_v46 = vmax.f32 %v872_v41, 0.0  ;;  %v952_v47 = vmax.f32 %v888_v43, 0.0 }
  0xd6   :  { %v1356_v48 = vpack.c.bf16 %v936_v46, %v935_v44  ;;  %v1396_v49 = vpack.c.bf16 %v952_v47, %v951_v45 }
  0xd8   :  { %1504 = vst [vmem:[#allocation8 + $0x10] sm:$0xff] %v1356_v48   ;;  %v600_v52 = vpop.f32.mrf.mxu2  ;;  %v640_v53 = vpop.f32.mrf.mxu3 }
  0xd9   :  { %1512 = vst [vmem:[#allocation8 + $0x50] sm:$0xff] %v1396_v49   ;;  %v904_v54 = vadd.f32 %v1682_v42, %v600_v52  ;;  %v920_v55 = vadd.f32 %v1682_v42, %v640_v53  ;;  %v523_v56 = vpop.f32.mrf.mxu0  ;;  %v563_v57 = vpop.f32.mrf.mxu1 }
  0xda   :  { %v873_v0 = vadd.f32 %v1682_v42, %v523_v56  ;;  %v889_v1 = vadd.f32 %v1682_v42, %v563_v57 }
  0xdb   :  { %v968_v60 = vmax.f32 %v904_v54, 0.0  ;;  %v984_v61 = vmax.f32 %v920_v55, 0.0 }
  0xdc   :  { %v937_v8 = vmax.f32 %v873_v0, 0.0  ;;  %v953_v9 = vmax.f32 %v889_v1, 0.0 }
  0xdd   :  { %v1436_v62 = vpack.c.bf16 %v968_v60, %v967_v58  ;;  %v1476_v63 = vpack.c.bf16 %v984_v61, %v983_v59 }
  0xdf   :  { %1520 = vst [vmem:[#allocation8 + $0x90] sm:$0xff] %v1436_v62  }
  0xe0   :  { %1528 = vst [vmem:[#allocation8 + $0xd0] sm:$0xff] %v1476_v63   ;;  %v603_v2 = vpop.f32.mrf.mxu2  ;;  %v643_v3 = vpop.f32.mrf.mxu3 }
  0xe1   :  { %v525_v4 = vpop.f32.mrf.mxu0  ;;  %v565_v5 = vpop.f32.mrf.mxu1  ;;  %v905_v14 = vadd.f32 %v1682_v42, %v603_v2  ;;  %v921_v15 = vadd.f32 %v1682_v42, %v643_v3 }
  0xe2   :  { %v874_v6 = vadd.f32 %v1682_v42, %v525_v4  ;;  %v890_v7 = vadd.f32 %v1682_v42, %v565_v5 }
  0xe3   :  { %v969_v22 = vmax.f32 %v905_v14, 0.0  ;;  %v985_v23 = vmax.f32 %v921_v15, 0.0 }
  0xe4   :  { %v938_v10 = vmax.f32 %v874_v6, 0.0  ;;  %v954_v11 = vmax.f32 %v890_v7, 0.0 }
  0xe6   :  { %v1361_v12 = vpack.c.bf16 %v938_v10, %v937_v8  ;;  %v1401_v13 = vpack.c.bf16 %v954_v11, %v953_v9 }
  0xe8   :  { %1505 = vst [vmem:[#allocation8 + $0x18] sm:$0xff] %v1361_v12   ;;  %v605_v16 = vpop.f32.mrf.mxu2  ;;  %v645_v17 = vpop.f32.mrf.mxu3 }
  0xe9   :  { %1513 = vst [vmem:[#allocation8 + $0x58] sm:$0xff] %v1401_v13   ;;  %v906_v18 = vadd.f32 %v1682_v42, %v605_v16  ;;  %v922_v19 = vadd.f32 %v1682_v42, %v645_v17  ;;  %v528_v20 = vpop.f32.mrf.mxu0  ;;  %v568_v21 = vpop.f32.mrf.mxu1 }
  0xea   :  { %v875_v28 = vadd.f32 %v1682_v42, %v528_v20  ;;  %v891_v29 = vadd.f32 %v1682_v42, %v568_v21 }
  0xeb   :  { %v970_v24 = vmax.f32 %v906_v18, 0.0  ;;  %v986_v25 = vmax.f32 %v922_v19, 0.0 }
  0xec   :  { %v939_v36 = vmax.f32 %v875_v28, 0.0  ;;  %v955_v37 = vmax.f32 %v891_v29, 0.0 }
  0xed   :  { %v1441_v26 = vpack.c.bf16 %v970_v24, %v969_v22  ;;  %v1481_v27 = vpack.c.bf16 %v986_v25, %v985_v23 }
  0xef   :  { %1521 = vst [vmem:[#allocation8 + $0x98] sm:$0xff] %v1441_v26  }
  0xf0   :  { %1529 = vst [vmem:[#allocation8 + $0xd8] sm:$0xff] %v1481_v27   ;;  %v608_v30 = vpop.f32.mrf.mxu2  ;;  %v648_v31 = vpop.f32.mrf.mxu3 }
  0xf1   :  { %v530_v32 = vpop.f32.mrf.mxu0  ;;  %v570_v33 = vpop.f32.mrf.mxu1  ;;  %v907_v43 = vadd.f32 %v1682_v42, %v608_v30  ;;  %v923_v44 = vadd.f32 %v1682_v42, %v648_v31 }
  0xf2   :  { %v876_v34 = vadd.f32 %v1682_v42, %v530_v32  ;;  %v892_v35 = vadd.f32 %v1682_v42, %v570_v33 }
  0xf3   :  { %v971_v51 = vmax.f32 %v907_v43, 0.0  ;;  %v987_v52 = vmax.f32 %v923_v44, 0.0 }
  0xf4   :  { %v940_v38 = vmax.f32 %v876_v34, 0.0  ;;  %v956_v39 = vmax.f32 %v892_v35, 0.0 }
  0xf6   :  { %v1366_v40 = vpack.c.bf16 %v940_v38, %v939_v36  ;;  %v1406_v41 = vpack.c.bf16 %v956_v39, %v955_v37 }
  0xf8   :  { %1506 = vst [vmem:[#allocation8 + $0x20] sm:$0xff] %v1366_v40   ;;  %v610_v45 = vpop.f32.mrf.mxu2  ;;  %v650_v46 = vpop.f32.mrf.mxu3 }
  0xf9   :  { %1514 = vst [vmem:[#allocation8 + $0x60] sm:$0xff] %v1406_v41   ;;  %v908_v47 = vadd.f32 %v1682_v42, %v610_v45  ;;  %v924_v48 = vadd.f32 %v1682_v42, %v650_v46  ;;  %v533_v49 = vpop.f32.mrf.mxu0  ;;  %v573_v50 = vpop.f32.mrf.mxu1 }
  0xfa   :  { %v877_v57 = vadd.f32 %v1682_v42, %v533_v49  ;;  %v893_v58 = vadd.f32 %v1682_v42, %v573_v50 }
  0xfb   :  { %v972_v53 = vmax.f32 %v908_v47, 0.0  ;;  %v988_v54 = vmax.f32 %v924_v48, 0.0 }
  0xfc   :  { %v941_v1 = vmax.f32 %v877_v57, 0.0  ;;  %v957_v2 = vmax.f32 %v893_v58, 0.0 }
  0xfd   :  { %v1446_v55 = vpack.c.bf16 %v972_v53, %v971_v51  ;;  %v1486_v56 = vpack.c.bf16 %v988_v54, %v987_v52 }
  0xff   :  { %1522 = vst [vmem:[#allocation8 + $0xa0] sm:$0xff] %v1446_v55  }
 0x100   :  { %1530 = vst [vmem:[#allocation8 + $0xe0] sm:$0xff] %v1486_v56   ;;  %v613_v59 = vpop.f32.mrf.mxu2  ;;  %v653_v60 = vpop.f32.mrf.mxu3 }
 0x101   :  { %v535_v61 = vpop.f32.mrf.mxu0  ;;  %v575_v62 = vpop.f32.mrf.mxu1  ;;  %v909_v7 = vadd.f32 %v1682_v42, %v613_v59  ;;  %v925_v8 = vadd.f32 %v1682_v42, %v653_v60 }
 0x102   :  { %v878_v63 = vadd.f32 %v1682_v42, %v535_v61  ;;  %v894_v0 = vadd.f32 %v1682_v42, %v575_v62 }
 0x103   :  { %v973_v15 = vmax.f32 %v909_v7, 0.0  ;;  %v989_v16 = vmax.f32 %v925_v8, 0.0 }
 0x104   :  { %v942_v3 = vmax.f32 %v878_v63, 0.0  ;;  %v958_v4 = vmax.f32 %v894_v0, 0.0 }
 0x106   :  { %v1371_v5 = vpack.c.bf16 %v942_v3, %v941_v1  ;;  %v1411_v6 = vpack.c.bf16 %v958_v4, %v957_v2 }
 0x108   :  { %1507 = vst [vmem:[#allocation8 + $0x28] sm:$0xff] %v1371_v5   ;;  %v615_v9 = vpop.f32.mrf.mxu2  ;;  %v655_v10 = vpop.f32.mrf.mxu3 }
 0x109   :  { %1515 = vst [vmem:[#allocation8 + $0x68] sm:$0xff] %v1411_v6   ;;  %v910_v11 = vadd.f32 %v1682_v42, %v615_v9  ;;  %v926_v12 = vadd.f32 %v1682_v42, %v655_v10  ;;  %v538_v13 = vpop.f32.mrf.mxu0  ;;  %v578_v14 = vpop.f32.mrf.mxu1 }
 0x10a   :  { %v879_v21 = vadd.f32 %v1682_v42, %v538_v13  ;;  %v895_v22 = vadd.f32 %v1682_v42, %v578_v14 }
 0x10b   :  { %v974_v17 = vmax.f32 %v910_v11, 0.0  ;;  %v990_v18 = vmax.f32 %v926_v12, 0.0 }
 0x10c   :  { %v943_v29 = vmax.f32 %v879_v21, 0.0  ;;  %v959_v30 = vmax.f32 %v895_v22, 0.0 }
 0x10d   :  { %v1451_v19 = vpack.c.bf16 %v974_v17, %v973_v15  ;;  %v1491_v20 = vpack.c.bf16 %v990_v18, %v989_v16 }
 0x10f   :  { %1523 = vst [vmem:[#allocation8 + $0xa8] sm:$0xff] %v1451_v19  }
 0x110   :  { %1531 = vst [vmem:[#allocation8 + $0xe8] sm:$0xff] %v1491_v20   ;;  %v618_v23 = vpop.f32.mrf.mxu2  ;;  %v658_v24 = vpop.f32.mrf.mxu3 }
 0x111   :  { %v540_v25 = vpop.f32.mrf.mxu0  ;;  %v580_v26 = vpop.f32.mrf.mxu1  ;;  %v911_v35 = vadd.f32 %v1682_v42, %v618_v23  ;;  %v927_v36 = vadd.f32 %v1682_v42, %v658_v24 }
 0x112   :  { %v880_v27 = vadd.f32 %v1682_v42, %v540_v25  ;;  %v896_v28 = vadd.f32 %v1682_v42, %v580_v26 }
 0x113   :  { %v975_v44 = vmax.f32 %v911_v35, 0.0  ;;  %v991_v45 = vmax.f32 %v927_v36, 0.0 }
 0x114   :  { %v944_v31 = vmax.f32 %v880_v27, 0.0  ;;  %v960_v32 = vmax.f32 %v896_v28, 0.0 }
 0x116   :  { %v1376_v33 = vpack.c.bf16 %v944_v31, %v943_v29  ;;  %v1416_v34 = vpack.c.bf16 %v960_v32, %v959_v30 }
 0x118   :  { %1508 = vst [vmem:[#allocation8 + $0x30] sm:$0xff] %v1376_v33   ;;  %v620_v37 = vpop.f32.mrf.mxu2  ;;  %v660_v38 = vpop.f32.mrf.mxu3 }
 0x119   :  { %1516 = vst [vmem:[#allocation8 + $0x70] sm:$0xff] %v1416_v34   ;;  %v912_v39 = vadd.f32 %v1682_v42, %v620_v37  ;;  %v928_v40 = vadd.f32 %v1682_v42, %v660_v38  ;;  %v543_v41 = vpop.f32.mrf.mxu0  ;;  %v583_v43 = vpop.f32.mrf.mxu1 }
 0x11a   :  { %v881_v50 = vadd.f32 %v1682_v42, %v543_v41  ;;  %v897_v51 = vadd.f32 %v1682_v42, %v583_v43 }
 0x11b   :  { %v976_v46 = vmax.f32 %v912_v39, 0.0  ;;  %v992_v47 = vmax.f32 %v928_v40, 0.0 }
 0x11c   :  { %v945_v58 = vmax.f32 %v881_v50, 0.0  ;;  %v961_v59 = vmax.f32 %v897_v51, 0.0 }
 0x11d   :  { %v1456_v48 = vpack.c.bf16 %v976_v46, %v975_v44  ;;  %v1496_v49 = vpack.c.bf16 %v992_v47, %v991_v45 }
 0x11f   :  { %1524 = vst [vmem:[#allocation8 + $0xb0] sm:$0xff] %v1456_v48  }
 0x120   :  { %1532 = vst [vmem:[#allocation8 + $0xf0] sm:$0xff] %v1496_v49   ;;  %v623_v52 = vpop.f32.mrf.mxu2  ;;  %v663_v53 = vpop.f32.mrf.mxu3 }
 0x121   :  { %v545_v54 = vpop.f32.mrf.mxu0  ;;  %v585_v55 = vpop.f32.mrf.mxu1  ;;  %v913_v0 = vadd.f32 %v1682_v42, %v623_v52  ;;  %v929_v1 = vadd.f32 %v1682_v42, %v663_v53 }
 0x122   :  { %v882_v56 = vadd.f32 %v1682_v42, %v545_v54  ;;  %v898_v57 = vadd.f32 %v1682_v42, %v585_v55 }
 0x123   :  { %v977_v6 = vmax.f32 %v913_v0, 0.0  ;;  %v993_v7 = vmax.f32 %v929_v1, 0.0 }
 0x124   :  { %v946_v60 = vmax.f32 %v882_v56, 0.0  ;;  %v962_v61 = vmax.f32 %v898_v57, 0.0 }
 0x126   :  { %v1381_v62 = vpack.c.bf16 %v946_v60, %v945_v58  ;;  %v1421_v63 = vpack.c.bf16 %v962_v61, %v961_v59 }
 0x128   :  { %1509 = vst [vmem:[#allocation8 + $0x38] sm:$0xff] %v1381_v62   ;;  %v625_v2 = vpop.f32.mrf.mxu2  ;;  %v665_v3 = vpop.f32.mrf.mxu3 }
 0x129   :  { %1517 = vst [vmem:[#allocation8 + $0x78] sm:$0xff] %v1421_v63   ;;  %v914_v4 = vadd.f32 %v1682_v42, %v625_v2  ;;  %v930_v5 = vadd.f32 %v1682_v42, %v665_v3 }
 0x12b   :  { %v978_v8 = vmax.f32 %v914_v4, 0.0  ;;  %v994_v9 = vmax.f32 %v930_v5, 0.0 }
 0x12d   :  { %v1461_v10 = vpack.c.bf16 %v978_v8, %v977_v6  ;;  %v1501_v11 = vpack.c.bf16 %v994_v9, %v993_v7 }
 0x12f   :  { %1525 = vst [vmem:[#allocation8 + $0xb8] sm:$0xff] %v1461_v10  }
 0x130   :  { %1533 = vst [vmem:[#allocation8 + $0xf8] sm:$0xff] %v1501_v11  }
 0x131   :  { %1135 = dma.vmem_to_hbm [thread:$0]  %s1128_s24, 4096, %s1130_s27, [#allocation5], %s1643_s20, %s1643_s20, %s1644_s21  }
 0x132   :  { %1640 = dma.done.wait [#allocation5], 4096  }
 0x133   :  { %1641 = vsyncadd [#allocation5], 4294963200 }
 0x134   :  { %1140 = vsyncpa [#allocation4], 1 }
 0x135   :  { %1141 = vsyncpa [#allocation7], 1 }
 0x136   :  { %1142 = vsyncpa [#allocation5], 1 }

</bundles_post_ra>
